<compile_context>
chip_gen: v7x
topology: tpu7x:2x2x1
jax: 0.10.0
libtpu: 0.0.40
codegen_flags: <defaults>
</compile_context>

<pallas_src>
import functools
import math

import jax
import jax.numpy as jnp
from jax import lax
from jax.experimental import pallas as pl
from jax.experimental.pallas import tpu as pltpu


def _round_up(x, m):
    return ((x + m - 1) // m) * m


# ------------------------------ LayerNorm kernel ------------------------------

def _layernorm_kernel(x_ref, g_ref, b_ref, o_ref, *, eps):
    """One tile of rows: (x - mean) * rsqrt(var + eps) * gamma + beta."""
    x = x_ref[...].astype(jnp.float32)                     # (TR, D)
    mean = jnp.mean(x, axis=-1, keepdims=True)
    xc = x - mean
    var = jnp.mean(xc * xc, axis=-1, keepdims=True)        # biased var (PyTorch LN)
    y = xc * lax.rsqrt(var + eps)
    o_ref[...] = (y * g_ref[...] + b_ref[...]).astype(o_ref.dtype)


def layer_norm_pallas(x, gamma, beta, *, eps=1e-5, tile_rows=1024):
    """LayerNorm over the last dim of x (arbitrary leading dims)."""
    orig_shape = x.shape
    d = orig_shape[-1]
    n = math.prod(orig_shape[:-1])
    x2 = x.reshape(n, d)                                   # reshape only, no transpose

    tr = _round_up(min(tile_rows, _round_up(n, 8)), 8)     # row tile, multiple of 8
    n_pad = _round_up(n, tr)
    if n_pad != n:
        x2 = jnp.pad(x2, ((0, n_pad - n), (0, 0)))

    out = pl.pallas_call(
        functools.partial(_layernorm_kernel, eps=eps),
        out_shape=jax.ShapeDtypeStruct((n_pad, d), x.dtype),
        grid_spec=pltpu.PrefetchScalarGridSpec(
            num_scalar_prefetch=0,
            grid=(n_pad // tr,),
            in_specs=[
                pl.BlockSpec((tr, d), lambda i: (i, 0)),   # rows on sublane, dim on lane
                pl.BlockSpec((1, d), lambda i: (0, 0)),    # gamma, resident
                pl.BlockSpec((1, d), lambda i: (0, 0)),    # beta, resident
            ],
            out_specs=pl.BlockSpec((tr, d), lambda i: (i, 0)),
        ),
        compiler_params=pltpu.CompilerParams(
            dimension_semantics=("parallel",)),            # megacore on v7x
    )(x2, gamma.reshape(1, d), beta.reshape(1, d))

    if n_pad != n:
        out = out[:n]
    return out.reshape(orig_shape)


# --------------------- demo `fn`: single-head self-attention -------------------

def _sdpa_kernel(x_ref, o_ref, *, scale):
    """Per-batch self-attention: softmax(x x^T * scale) @ x."""
    x = x_ref[...].astype(jnp.float32)                     # (T, D)
    s = jnp.dot(x, x.T, preferred_element_type=jnp.float32) * scale
    s = s - jnp.max(s, axis=-1, keepdims=True)
    p = jnp.exp(s)
    p = p / jnp.sum(p, axis=-1, keepdims=True)
    o_ref[...] = jnp.dot(p, x, preferred_element_type=jnp.float32).astype(o_ref.dtype)


def sdpa_pallas(x):
    """Single-head scaled-dot-product self-attention, x: (B, T, D) -> (B, T, D)."""
    b, t, d = x.shape
    scale = 1.0 / math.sqrt(d)
    spec = pl.BlockSpec((None, t, d), lambda i: (i, 0, 0))  # squeeze batch dim
    return pl.pallas_call(
        functools.partial(_sdpa_kernel, scale=scale),
        out_shape=jax.ShapeDtypeStruct((b, t, d), x.dtype),
        grid_spec=pltpu.PrefetchScalarGridSpec(
            num_scalar_prefetch=0,
            grid=(b,),
            in_specs=[spec],
            out_specs=spec,
        ),
        compiler_params=pltpu.CompilerParams(
            dimension_semantics=("parallel",)),
    )(x)


# ------------------------------ PreNormAttn forward ----------------------------

def pre_norm_attn(feat, fn, gamma, beta, *, eps=1e-5, **kwargs):
    """PreNormAttn.forward: fn(LayerNorm(feat), **kwargs)."""
    # TODO(synk): `fn` is an arbitrary user-supplied submodule in the PyTorch
    # spec; here it is any JAX callable (the demo binds the Pallas SDPA above).
    return fn(layer_norm_pallas(feat, gamma, beta, eps=eps), **kwargs)


# ---------------------------------- reference ----------------------------------

def _reference(feat, gamma, beta, eps=1e-5):
    mean = jnp.mean(feat, axis=-1, keepdims=True)
    var = jnp.mean((feat - mean) ** 2, axis=-1, keepdims=True)
    x = (feat - mean) / jnp.sqrt(var + eps) * gamma + beta
    scale = 1.0 / math.sqrt(x.shape[-1])
    s = jnp.einsum('btd,bsd->bts', x, x) * scale
    p = jax.nn.softmax(s, axis=-1)
    return jnp.einsum('bts,bsd->btd', p, x)


if __name__ == "__main__":
    key = jax.random.PRNGKey(0)
    k_x, k_g, k_b = jax.random.split(key, 3)

    B, T, D = 2, 8, 32                                      # small demo shapes
    feat = jax.random.normal(k_x, (B, T, D), dtype=jnp.float32)
    gamma = 1.0 + 0.1 * jax.random.normal(k_g, (D,), dtype=jnp.float32)
    beta = 0.1 * jax.random.normal(k_b, (D,), dtype=jnp.float32)

    forward = jax.jit(lambda f, g, b: pre_norm_attn(f, sdpa_pallas, g, b))
    out = jax.block_until_ready(forward(feat, gamma, beta))

    ref = _reference(feat, gamma, beta)
    assert out.shape == (B, T, D), out.shape
    assert jnp.allclose(out, ref, atol=1e-4, rtol=1e-4), "mismatch vs reference"

    print("KERNEL_OK")
</pallas_src>

<mosaic_0001>
module attributes {stable_mosaic.version = 11 : i64} {
  func.func @_sdpa_kernel(%arg0: i32, %arg1: memref<1x8x32xf32, #tpu.memory_space<vmem>>, %arg2: memref<1x8x32xf32, #tpu.memory_space<vmem>>) attributes {dimension_semantics = [#tpu.dimension_semantics<parallel>], iteration_bounds = array<i64: 2>, scalar_prefetch = 0 : i64, scratch_operands = 0 : i64, tpu.core_type = #tpu.core_type<tc>, window_params = [{transform_indices = @transform_0, window_bounds = array<i64: 1, 8, 32>}, {transform_indices = @transform_1, window_bounds = array<i64: 1, 8, 32>}]} {
    %c0 = arith.constant 0 : index
    %c0_0 = arith.constant 0 : index
    %c0_1 = arith.constant 0 : index
    %0 = vector.load %arg1[%c0, %c0_0, %c0_1] : memref<1x8x32xf32, #tpu.memory_space<vmem>>, vector<1x8x32xf32>
    %1 = vector.shape_cast %0 : vector<1x8x32xf32> to vector<8x32xf32>
    %2 = tpu.transpose %1, [1, 0] : vector<8x32xf32> -> vector<32x8xf32>
    %cst = arith.constant dense<0.000000e+00> : vector<8x8xf32>
    %3 = tpu.matmul %1, %2, %cst {dimension_numbers = #tpu.dot_dimension_numbers<[1], [0], [0], [1], [0, 0, 1, 1], [], []>} : vector<8x32xf32>, vector<32x8xf32>, vector<8x8xf32> -> vector<8x8xf32>
    %cst_2 = arith.constant 0.176776692 : f32
    %4 = vector.broadcast %cst_2 : f32 to vector<8x8xf32>
    %5 = arith.mulf %3, %4 : vector<8x8xf32>
    %cst_3 = arith.constant dense<0xFF800000> : vector<8xf32>
    %6 = vector.multi_reduction <maximumf>, %5, %cst_3 [1] : vector<8x8xf32> to vector<8xf32>
    %7 = vector.shape_cast %6 : vector<8xf32> to vector<8x1xf32>
    %8 = vector.broadcast %7 : vector<8x1xf32> to vector<8x8xf32>
    %9 = arith.subf %5, %8 : vector<8x8xf32>
    %10 = math.exp %9 : vector<8x8xf32>
    %cst_4 = arith.constant dense<0.000000e+00> : vector<8xf32>
    %11 = vector.multi_reduction <add>, %10, %cst_4 [1] : vector<8x8xf32> to vector<8xf32>
    %12 = vector.shape_cast %11 : vector<8xf32> to vector<8x1xf32>
    %13 = vector.broadcast %12 : vector<8x1xf32> to vector<8x8xf32>
    %14 = arith.divf %10, %13 : vector<8x8xf32>
    %cst_5 = arith.constant dense<0.000000e+00> : vector<8x32xf32>
    %15 = tpu.matmul %14, %1, %cst_5 {dimension_numbers = #tpu.dot_dimension_numbers<[1], [0], [0], [1], [0, 0, 1, 1], [], []>} : vector<8x8xf32>, vector<8x32xf32>, vector<8x32xf32> -> vector<8x32xf32>
    %c0_6 = arith.constant 0 : index
    %c0_7 = arith.constant 0 : index
    %c0_8 = arith.constant 0 : index
    %16 = vector.load %arg2[%c0_6, %c0_7, %c0_8] : memref<1x8x32xf32, #tpu.memory_space<vmem>>, vector<1x8x32xf32>
    %17 = vector.shape_cast %16 : vector<1x8x32xf32> to vector<8x32xf32>
    %18 = vector.shape_cast %15 : vector<8x32xf32> to vector<1x8x32xf32>
    tpu.vector_store %arg2[%c0_6, %c0_7, %c0_8], %18 {strides = array<i32>} : memref<1x8x32xf32, #tpu.memory_space<vmem>>, vector<1x8x32xf32>,
    return
  }
  func.func @transform_0(%arg0: i32) -> (i32, i32, i32) {
    %c0_i32 = arith.constant 0 : i32
    %c0_i32_0 = arith.constant 0 : i32
    %c0_i32_1 = arith.constant 0 : i32
    return %arg0, %c0_i32, %c0_i32_0 : i32, i32, i32
  }
  func.func @transform_1(%arg0: i32) -> (i32, i32, i32) {
    %c0_i32 = arith.constant 0 : i32
    %c0_i32_0 = arith.constant 0 : i32
    %c0_i32_1 = arith.constant 0 : i32
    return %arg0, %c0_i32, %c0_i32_0 : i32, i32, i32
  }
}

module attributes {stable_mosaic.version = 11 : i64} {
  func.func @_layernorm_kernel(%arg0: i32, %arg1: memref<16x32xf32, #tpu.memory_space<vmem>>, %arg2: memref<1x32xf32, #tpu.memory_space<vmem>>, %arg3: memref<1x32xf32, #tpu.memory_space<vmem>>, %arg4: memref<16x32xf32, #tpu.memory_space<vmem>>) attributes {dimension_semantics = [#tpu.dimension_semantics<parallel>], iteration_bounds = array<i64: 1>, scalar_prefetch = 0 : i64, scratch_operands = 0 : i64, tpu.core_type = #tpu.core_type<tc>, window_params = [{transform_indices = @transform_0, window_bounds = array<i64: 16, 32>}, {pipeline_mode = #tpu.pipeline_mode<synchronous>, transform_indices = @transform_1, window_bounds = array<i64: 1, 32>}, {pipeline_mode = #tpu.pipeline_mode<synchronous>, transform_indices = @transform_2, window_bounds = array<i64: 1, 32>}, {transform_indices = @transform_3, window_bounds = array<i64: 16, 32>}]} {
    %c0 = arith.constant 0 : index
    %c0_0 = arith.constant 0 : index
    %0 = vector.load %arg1[%c0, %c0_0] : memref<16x32xf32, #tpu.memory_space<vmem>>, vector<16x32xf32>
    %cst = arith.constant dense<0.000000e+00> : vector<16xf32>
    %1 = vector.multi_reduction <add>, %0, %cst [1] : vector<16x32xf32> to vector<16xf32>
    %2 = vector.shape_cast %1 : vector<16xf32> to vector<16x1xf32>
    %cst_1 = arith.constant 3.200000e+01 : f32
    %3 = vector.broadcast %cst_1 : f32 to vector<16x1xf32>
    %4 = arith.divf %2, %3 : vector<16x1xf32>
    %5 = vector.broadcast %4 : vector<16x1xf32> to vector<16x32xf32>
    %6 = arith.subf %0, %5 : vector<16x32xf32>
    %7 = arith.mulf %6, %6 : vector<16x32xf32>
    %cst_2 = arith.constant dense<0.000000e+00> : vector<16xf32>
    %8 = vector.multi_reduction <add>, %7, %cst_2 [1] : vector<16x32xf32> to vector<16xf32>
    %9 = vector.shape_cast %8 : vector<16xf32> to vector<16x1xf32>
    %cst_3 = arith.constant 3.200000e+01 : f32
    %10 = vector.broadcast %cst_3 : f32 to vector<16x1xf32>
    %11 = arith.divf %9, %10 : vector<16x1xf32>
    %cst_4 = arith.constant 9.99999974E-6 : f32
    %12 = vector.broadcast %cst_4 : f32 to vector<16x1xf32>
    %13 = arith.addf %11, %12 : vector<16x1xf32>
    %14 = math.rsqrt %13 : vector<16x1xf32>
    %15 = vector.broadcast %14 : vector<16x1xf32> to vector<16x32xf32>
    %16 = arith.mulf %6, %15 : vector<16x32xf32>
    %c0_5 = arith.constant 0 : index
    %c0_6 = arith.constant 0 : index
    %17 = vector.load %arg2[%c0_5, %c0_6] : memref<1x32xf32, #tpu.memory_space<vmem>>, vector<1x32xf32>
    %18 = vector.broadcast %17 : vector<1x32xf32> to vector<16x32xf32>
    %19 = arith.mulf %16, %18 : vector<16x32xf32>
    %c0_7 = arith.constant 0 : index
    %c0_8 = arith.constant 0 : index
    %20 = vector.load %arg3[%c0_7, %c0_8] : memref<1x32xf32, #tpu.memory_space<vmem>>, vector<1x32xf32>
    %21 = vector.broadcast %20 : vector<1x32xf32> to vector<16x32xf32>
    %22 = arith.addf %19, %21 : vector<16x32xf32>
    %c0_9 = arith.constant 0 : index
    %c0_10 = arith.constant 0 : index
    %23 = vector.load %arg4[%c0_9, %c0_10] : memref<16x32xf32, #tpu.memory_space<vmem>>, vector<16x32xf32>
    tpu.vector_store %arg4[%c0_9, %c0_10], %22 {strides = array<i32>} : memref<16x32xf32, #tpu.memory_space<vmem>>, vector<16x32xf32>,
    return
  }
  func.func @transform_0(%arg0: i32) -> (i32, i32) {
    %c0_i32 = arith.constant 0 : i32
    %c0_i32_0 = arith.constant 0 : i32
    return %arg0, %c0_i32 : i32, i32
  }
  func.func @transform_1(%arg0: i32) -> (i32, i32) {
    %c0_i32 = arith.constant 0 : i32
    %c0_i32_0 = arith.constant 0 : i32
    %c0_i32_1 = arith.constant 0 : i32
    return %c0_i32, %c0_i32_0 : i32, i32
  }
  func.func @transform_2(%arg0: i32) -> (i32, i32) {
    %c0_i32 = arith.constant 0 : i32
    %c0_i32_0 = arith.constant 0 : i32
    %c0_i32_1 = arith.constant 0 : i32
    return %c0_i32, %c0_i32_0 : i32, i32
  }
  func.func @transform_3(%arg0: i32) -> (i32, i32) {
    %c0_i32 = arith.constant 0 : i32
    %c0_i32_0 = arith.constant 0 : i32
    return %arg0, %c0_i32 : i32, i32
  }
}

</mosaic_0001>

<bundles_post_ra>
// kernel: _lambda_.3
= control target key start
LH: loop header
LB: loop body
LE: loop exit
PB: predicated region body
PF: predicated region fallthrough
CT: control target
= control target key end

     0   :  { %6 = vsyncpa [#allocation3], 0  ;;  %s602_s0 = inlined_call_operand.vmem [shape: f32[2,8,32], index: 0, kind: input, shape index: {}]   ;;  %s603_s1 = inlined_call_operand.hbm [shape: f32[2,8,32], index: 1, kind: output, shape index: {}]  }
   0x1   :  { %8 = vsyncpa [#allocation3 + $0x1], 0  ;;  %s496_s6 = smov 0   ;;  %s498_s7 = smov 0  }
   0x2   :  { %s500_s8 = smov 0   ;;  %s502_s9 = smov 0  }
   0x3 LB: > { %s517_s10 = sadd.s32 4294967295, %s481_s9   ;;  %s347_s11 = sadd.s32 4294967294, %s481_s9   ;;  %s481_s9 = sphi %s502_s9, %s609_s9   ;;  %s477_s8 = sphi %s500_s8, %s608_s8   ;;  %s473_s7 = sphi %s498_s7, %s607_s7   ;;  %s469_s6 = sphi %s496_s6, %s606_s6  }
   0x4   : > { %s521_s12 = sadd.s32 1, %s481_s9   ;;  %s47_s13 = sadd.s32 1, %s477_s8 }
   0x5   : > { %s44_s14 = ssub.s32 %s481_s9, %s521_s12  ;;  %p57_p0 = scmp.ne.s32.totalorder %s477_s8, %s473_s7 }
   0x6   : > { %p45_p1 = scmp.eq.s32.totalorder %s44_s14, 0  ;;  %p58_p2 = scmp.eq.s32.totalorder %s517_s10, 1 }
   0x7   : > { %p63_p3 = scmp.ne.s32.totalorder %s473_s7, %s469_s6  ;;  %p64_p4 = scmp.eq.s32.totalorder %s347_s11, 1 }
   0x8   : > { %s532_s15 = scalar_select %p45_p1, %s477_s8, %s47_s13  }
   0x9   : > { %p534_p5 = por %p58_p2, %p57_p0  ;;  %p538_p6 = por %p64_p4, %p63_p3 }
   0xa   : > { %p350_p7 = scmp.ge.s32.totalorder %s481_s9, 1  ;;  %p89_p8 = scmp.lt.s32.totalorder %s481_s9, 3 }
   0xc   : > { %p90_p9 = pnand %p350_p7, %p89_p8 }
   0xd   : > { %p108_p10 = scmp.lt.s32.totalorder (!%p90_p9), %s517_s10, 1  ;;  %v483_v0 = vmov (!%p90_p9), 0.0   ;;  %vm484_vm0 = vmmov (!%p90_p9), 0   ;;  %vm113_vm1 = vcmask (!%p90_p9), 261120   ;;  %vm188_vm2 = vcmask (!%p90_p9), 64512   ;;  %s105_s23 = sand.u32 (!%p90_p9), 1, %s473_s7  }
   0xe   : > { %93 = sbr.rel (%p90_p9) target bundleno = 783 (0x30f), region = 24  ;;  %364 = vmatprep.subr.mxu0 (!%p90_p9), %v483_v0  ;;  %366 = vmatprep.mubr.msk.f32.mxu0 (!%p90_p9), %vm484_vm0, %v483_v0  ;;  %s351_s24 = sshll.u32 (!%p90_p9), %s105_s23, 3 }
   0xf   : > { %369 = vmatprep.subr.mxu1 (!%p90_p9), %v483_v0  ;;  %371 = vmatprep.mubr.msk.f32.mxu1 (!%p90_p9), %vm484_vm0, %v483_v0  ;;  %s357_s25 = sshll.u32 (!%p90_p9), %s517_s10, 7  ;;  %s107_s26 = scalar_lea.vmem (!%p90_p9), [#allocation2], %s351_s24 }
  0x10   : > { %s288_s27 = sshll.u32 (!%p90_p9), %s107_s26, 4  ;;  %s559_s30 = scalar_lea.hbm (!%p90_p9), %s603_s1, %s357_s25  ;;  %s561_s27 = int_to_ptr.vmem [resolvable:$true] %s288_s27 }
  0x11   : > { %s275_s2 = scalar_lea.sflag (!%p90_p9), [#allocation3], %s105_s23  ;;  %s419_s3 = scalar_lea.vmem (!%p90_p9), %s561_s27, 128 }
  0x12   : > { %p420_p11 = scmp.ne.s32.totalorder (!%p90_p9), %s561_s27, %s419_s3  ;;  %s485_s4 = smov (!%p90_p9), [#allocation2]  }
  0x13   : > { %s423_s5 = sshll.u32 (!%p90_p9), %s485_s4, 4  ;;  %s424_s5 = int_to_ptr.vmem [resolvable:$false] %s423_s5 }
  0x14   : > { %p421_p12 = pnand (!%p90_p9), %p420_p11, %p534_p5  ;;  %p426_p0 = scmp.lt.s32.totalorder (!%p90_p9), %s561_s27, %s424_s5 }
  0x15   : > { %s109_s18 = scalar_select %p108_p10, %s517_s10, 1 }
  0x16   : > { %p422_p13 = pneg %p421_p12  ;;  %s425_s10 = scalar_lea.vmem %s424_s5, 256 }
  0x17   : > { %s352_s19 = sshll.u32 %s109_s18, 3  ;;  %p427_p1 = scmp.lt.s32.totalorder %s425_s10, %s419_s3 }
  0x18   : > { %s111_s22 = scalar_lea.vmem %s602_s0, %s352_s19 }
  0x19   : > { %v112_v1 = vld [vmem:[%s111_s22] sm:$0xff]  ;;  %p428_p2 = por %p427_p1, %p426_p0 }
  0x1a   : > { %365 = vmatpush3.xpose.msk.msra.mxu0 %vm113_vm1, %v112_v1  ;;  %370 = vmatpush3.msra.mxu1 %v112_v1 }
  0x1b   : > { %p429_p3 = pnand %p428_p2, %p422_p13 }
  0x1d   : > { %367 = vmatmul.mubr.msk.f32.vlgmr.msra.gmra.mrb[0].mxu0 %vm113_vm1, %v112_v1 }
  0xf0   : > { %v183_v2 = vpop.f32.mrb[0].mxu0 }
  0xf1   : > { %v187_v3 = vmul.f32 0.17677669, %v183_v2  ;;  %v368_v4 = vpop.f32.mrb[1].mxu0 }
  0xf3   : > { %v189_v5 = vsel %vm188_vm2, %v187_v3, -inf }
  0xf4   : > { %190 = vmax.xlane.f32.xlu0 %v189_v5 }
 0x181   : > { %v191_v6 = vpop.xlane.xlu0 %190 }
 0x182   : > { %v192_v7 = vsub.f32 %v187_v3, %v191_v6 }
 0x184   : > { %v193_v8 = vmul.f32 1.442695, %v192_v7 }
 0x186   : > { %415 = vpow2.f32 %v193_v8 }
 0x190   : > { %v416_v9 = vpop.eup %415 }
 0x191   : > { %v195_v10 = vsel %vm188_vm2, %v416_v9, 0.0 }
 0x192   : > { %196 = vadd.xlane.f32.xlu0 %v195_v10 }
 0x21f   : > { %v197_v11 = vpop.xlane.xlu0 %196 }
 0x220   : > { %417 = vrcp.f32 %v197_v11 }
 0x22a   : > { %v418_v12 = vpop.eup %417 }
 0x22b   : > { %v199_v13 = vmul.f32 %v418_v12, %v416_v9 }
 0x22d   : > { %372 = vmatmul.mubr.msk.f32.vlgmr.msra.gmra.mrb[0].mxu1 %vm188_vm2, %v199_v13 }
 0x300   : > { %v269_v14 = vpop.f32.mrb[0].mxu1 }
 0x301   : > { %273 = vst.msk [vmem:[%s107_s26] sm:$0xff] %vm113_vm1, %v269_v14  ;;  %v373_v15 = vpop.f32.mrb[1].mxu1 }
 0x302   : > { %432 = shalt.err (!%p429_p3)
}
 0x303   : > { %s433_s11 = scalar_lea.hbm %s559_s30, 128  ;;  %s437_s18 = scalar_lea.hbm %s603_s1, 256 }
 0x304   : > { %p434_p4 = scmp.ne.s32.totalorder %s559_s30, %s433_s11  ;;  %p438_p9 = scmp.lt.u32.totalorder %s559_s30, %s603_s1 }
 0x305   : > { %p439_p10 = scmp.lt.u32.totalorder %s437_s18, %s433_s11  ;;  %p441_p12 = scmp.lt.u32.totalorder %s433_s11, %s559_s30 }
 0x306   : > { %p435_p7 = pnand %p434_p4, %p534_p5 }
 0x307   : > { %p440_p11 = por %p439_p10, %p438_p9 }
 0x308   : > { %p436_p8 = pneg %p435_p7 }
 0x309   : > { %p442_p13 = por %p441_p12, %p440_p11 }
 0x30b   : > { %p443_p0 = pnand %p442_p13, %p436_p8 }
 0x30d   : > { %446 = shalt.err (!%p443_p0)
}
 0x30e   : > { %374 = dma.vmem_to_hbm [thread:$0]  (%p534_p5), %s561_s27, 128, %s559_s30, %s275_s2  }
 0x30f PF: > { %p380_p1 = scmp.ge.s32.totalorder %s481_s9, 2  ;;  %s300_s21 = sand.u32 1, %s469_s6  }
 0x310   : > { %s301_s22 = scalar_lea.sflag [#allocation3], %s300_s21 }
 0x311   : > { %p377_p2 = pnand %p380_p1, %p538_p6 }
 0x313   : > { %464 = dma.done.wait (!%p377_p2), %s301_s22, 128  }
 0x314   : > { %466 = vsyncadd (!%p377_p2), %s301_s22, 4294967168  ;;  %p11_p3 = scmp.ge.s32.totalorder %s521_s12, 4   ;;  %s606_s6 = smov %s473_s7 }
 0x315   : > { %s607_s7 = smov %s477_s8  ;;  %s608_s8 = smov %s532_s15 }
 0x316   : > { %s609_s9 = smov %s521_s12  ;;  %13 = sbr.rel (!%p11_p3) target bundleno = 3 (0x3), region = 59 }
 0x31d   :  { %306 = vsyncpa [#allocation3], 1 }
 0x31e   :  { %308 = vsyncpa [#allocation3 + $0x1], 1 }

// kernel: _lambda_.2
= control target key start
LH: loop header
LB: loop body
LE: loop exit
PB: predicated region body
PF: predicated region fallthrough
CT: control target
= control target key end

     0   :  { %8 = vsyncpa [#allocation3], 0  ;;  %s116_s12 = smov [#allocation2]   ;;  %s169_s0 = inlined_call_operand.hbm [shape: f32[16,32], index: 0, kind: input, shape index: {}]   ;;  %s170_s1 = inlined_call_operand.vmem [shape: f32[1,32], index: 1, kind: input, shape index: {}]   ;;  %s171_s2 = inlined_call_operand.vmem [shape: f32[1,32], index: 2, kind: input, shape index: {}]   ;;  %s172_s3 = inlined_call_operand.vmem [shape: f32[16,32], index: 3, kind: output, shape index: {}]  }
   0x1   :  { %s14_s13 = sshll.u32 %s116_s12, 4  ;;  %s92_s16 = scalar_lea.hbm %s169_s0, 256  ;;  %s15_s13 = int_to_ptr.vmem [resolvable:$true] %s14_s13 }
   0x2   :  { %p93_p0 = scmp.ne.s32.totalorder %s169_s0, %s92_s16  ;;  %p96_p1 = scmp.lt.u32.totalorder %s92_s16, %s169_s0 }
   0x4   :  { %p98_p2 = pnand %p96_p1, %p93_p0 }
   0x6   :  { %101 = shalt.err (!%p98_p2)
}
   0x7   :  { %s102_s21 = scalar_lea.vmem %s15_s13, 256  ;;  %p107_p4 = scmp.lt.s32.totalorder %s15_s13, %s15_s13 }
   0x8   :  { %p103_p3 = scmp.ne.s32.totalorder %s15_s13, %s102_s21  ;;  %p108_p5 = scmp.lt.s32.totalorder %s102_s21, %s102_s21 }
   0xa   :  { %p109_p6 = por %p108_p5, %p107_p4 }
   0xc   :  { %p110_p7 = pnand %p109_p6, %p103_p3 }
   0xe   :  { %113 = shalt.err (!%p110_p7)
}
   0xf   :  { %s117_s22 = smov 128   ;;  %s118_s23 = smov 8  }
  0x10   :  { %20 = dma.hbm_to_vmem [thread:$0]  %s169_s0, 256, %s15_s13, [#allocation3], %s117_s22, %s117_s22, %s118_s23  }
  0x11   :  { %114 = dma.done.wait [#allocation3], 256  }
  0x12   :  { %115 = vsyncadd [#allocation3], 4294967040  ;;  %vm30_vm0 = vcmask 261120   ;;  %v28_v0 = vld [vmem:[#allocation2] sm:$0xff]  ;;  %v29_v1 = vld [vmem:[#allocation2 + $0x8] sm:$0xff] }
  0x13   :  { %v31_v2 = vsel %vm30_vm0, %v28_v0, 0.0  ;;  %v34_v3 = vsel %vm30_vm0, %v29_v1, 0.0  ;;  %v83_v21 = vld [vmem:[%s170_s1] ss:$0 sm:$0xff] }
  0x14   :  { %32 = vadd.xlane.f32.xlu0 %v31_v2  ;;  %v84_v23 = vld [vmem:[%s171_s2] ss:$0 sm:$0xff] }
  0x18   :  { %35 = vadd.xlane.f32.xlu0 %v34_v3 }
  0xa1   :  { %v33_v4 = vpop.xlane.xlu0 %32 }
  0xa2   :  { %v38_v5 = vmul.f32 0.03125, %v33_v4 }
  0xa4   :  { %v40_v6 = vsub.f32 %v28_v0, %v38_v5 }
  0xa5   :  { %v36_v7 = vpop.xlane.xlu0 %35 }
  0xa6   :  { %v39_v8 = vmul.f32 0.03125, %v36_v7  ;;  %v42_v9 = vmul.f32 %v40_v6, %v40_v6 }
  0xa8   :  { %v41_v10 = vsub.f32 %v29_v1, %v39_v8  ;;  %v44_v11 = vsel %vm30_vm0, %v42_v9, 0.0 }
  0xa9   :  { %45 = vadd.xlane.f32.xlu1 %v44_v11 }
  0xaa   :  { %v43_v12 = vmul.f32 %v41_v10, %v41_v10 }
  0xac   :  { %v47_v13 = vsel %vm30_vm0, %v43_v12, 0.0 }
  0xad   :  { %48 = vadd.xlane.f32.xlu1 %v47_v13 }
 0x136   :  { %v46_v14 = vpop.xlane.xlu1 %45 }
 0x137   :  { %v50_v15 = vmul.f32 0.03125, %v46_v14 }
 0x139   :  { %v52_v16 = vadd.f32 1e-05, %v50_v15 }
 0x13a   :  { %v49_v17 = vpop.xlane.xlu1 %48 }
 0x13b   :  { %88 = vrsqrt.f32 %v52_v16  ;;  %v51_v18 = vmul.f32 0.03125, %v49_v17 }
 0x13d   :  { %v53_v19 = vadd.f32 1e-05, %v51_v18 }
 0x13f   :  { %90 = vrsqrt.f32 %v53_v19 }
 0x145   :  { %v89_v20 = vpop.eup %88 }
 0x146   :  { %v56_v22 = vmul.f32 %v89_v20, %v40_v6 }
 0x148   :  { %v65_v24 = vmul.f32 %v83_v21, %v56_v22 }
 0x149   :  { %v91_v25 = vpop.eup %90 }
 0x14a   :  { %v74_v26 = vadd.f32 %v84_v23, %v65_v24  ;;  %v57_v27 = vmul.f32 %v91_v25, %v41_v10 }
 0x14c   :  { %76 = vst.msk [vmem:[%s172_s3] sm:$0xff] %vm30_vm0, %v74_v26  ;;  %v66_v28 = vmul.f32 %v83_v21, %v57_v27 }
 0x14e   :  { %v75_v29 = vadd.f32 %v84_v23, %v66_v28 }
 0x150   :  { %77 = vst.msk [vmem:[%s172_s3 + $0x8] sm:$0xff] %vm30_vm0, %v75_v29 }
 0x151   :  { %82 = vsyncpa [#allocation3], 1 }

</bundles_post_ra>
